<compile_context>
chip_gen: v5e
topology: v5e:2x2
jax: 0.10.0
libtpu: 0.0.40
codegen_flags: <defaults>
</compile_context>

<pallas_src>
import functools

import jax
import jax.numpy as jnp
from jax import lax
from jax.experimental import pallas as pl
from jax.experimental.pallas import tpu as pltpu


_MIN_PALLAS_ELEMS = 1 << 18  # below this, XLA fusion beats kernel-launch overhead


def _tpu_config():
    """Generation-aware (ncores, input-block bytes, vmem limit)."""
    kind = ""
    try:
        kind = (jax.devices()[0].device_kind or "").lower()
    except Exception:
        pass
    # Conservative defaults are v7x-safe (64 MiB VMEM per TensorCore, 2 TCs).
    ncores, block_bytes, vmem_limit = 2, 4 * 1024 * 1024, 40 * 1024 * 1024
    if ("v5e" in kind) or ("v6e" in kind) or ("lite" in kind):
        # Single TensorCore, 128 MiB physical VMEM -> bigger streaming blocks.
        ncores, block_bytes, vmem_limit = 1, 8 * 1024 * 1024, 64 * 1024 * 1024
    return ncores, block_bytes, vmem_limit


def _choose_lanes(total):
    """Largest lane width that divides `total` and leaves >= 8 rows."""
    for lanes in (2048, 1024, 512, 256, 128):
        if total % lanes == 0 and total // lanes >= 8:
            return lanes
    return None


def _elem_loss(m_ref, t_ref, p):
    m = m_ref[...].astype(jnp.float32)
    t = t_ref[...].astype(jnp.float32)
    diff = jnp.abs(m - t)
    if p == 1:
        return diff
    if p == 2:
        return diff * diff          # keep the squared path on the VALU
    return diff ** p


# --------------------------------------------------------------------------
# Fast path: do_root=False  ->  sum(|m - t|**p) per core (separable mean).
# --------------------------------------------------------------------------
def _sum_pow_kernel(m_ref, t_ref, out_ref, acc_ref, *, p, tile_rows, lanes,
                    rows, tiles_per_core, need_mask):
    """Grid = (ncores, tiles_per_core); acc is a small (8, lanes) partial."""
    c = pl.program_id(0)
    j = pl.program_id(1)

    @pl.when(j == 0)
    def _():
        acc_ref[...] = jnp.zeros_like(acc_ref)

    loss = _elem_loss(m_ref, t_ref, p)

    if need_mask:  # static: only emitted when some tile is partial / clamped
        t_idx = c * tiles_per_core + j
        valid = rows - t_idx * tile_rows
        row_ids = lax.broadcasted_iota(jnp.int32, (tile_rows, lanes), 0)
        loss = jnp.where(row_ids < valid, loss, 0.0)

    # Fold tile_rows -> 8 sublanes with pure vreg-to-vreg adds (no XLU).
    acc_ref[...] += loss.reshape(tile_rows // 8, 8, lanes).sum(axis=0)

    @pl.when(j == pl.num_programs(1) - 1)
    def _():
        out_ref[0] = acc_ref[...]          # lane-dense (8, lanes) store


def _pnorm_loss_separable(mask, target, *, p, total):
    lanes = _choose_lanes(total)
    ncores, block_bytes, vmem_limit = _tpu_config()

    rows = total // lanes
    tile_rows = max(8, (block_bytes // (lanes * 4)) // 8 * 8)
    tile_rows = min(tile_rows, (rows // 8) * 8)        # never exceed array rows
    num_tiles = pl.cdiv(rows, tile_rows)
    tiles_per_core = pl.cdiv(num_tiles, ncores)
    need_mask = (ncores * tiles_per_core * tile_rows != rows)

    # Free re-view: lanes divides total, so no pad / extra HBM pass.
    m2d = mask.reshape(rows, lanes)
    t2d = target.reshape(rows, lanes)

    kernel = functools.partial(
        _sum_pow_kernel, p=p, tile_rows=tile_rows, lanes=lanes, rows=rows,
        tiles_per_core=tiles_per_core, need_mask=need_mask)

    last_tile = num_tiles - 1

    def in_map(c, j):
        # Clamp tiles past the end; their contribution is zeroed in-kernel.
        return (jnp.minimum(c * tiles_per_core + j, last_tile), 0)

    partials = pl.pallas_call(
        kernel,
        out_shape=jax.ShapeDtypeStruct((ncores, 8, lanes), jnp.float32),
        grid_spec=pltpu.PrefetchScalarGridSpec(
            num_scalar_prefetch=0,
            grid=(ncores, tiles_per_core),
            in_specs=[pl.BlockSpec((tile_rows, lanes), in_map),
                      pl.BlockSpec((tile_rows, lanes), in_map)],
            out_specs=pl.BlockSpec((1, 8, lanes), lambda c, j: (c, 0, 0)),
            scratch_shapes=[pltpu.VMEM((8, lanes), jnp.float32)],
        ),
        compiler_params=pltpu.CompilerParams(
            dimension_semantics=("parallel", "arbitrary"),
            vmem_limit_bytes=vmem_limit,
        ),
    )(m2d, t2d)
    # Tiny final reduce of the per-core lane-dense partials in plain JAX.
    return jnp.sum(partials) / jnp.float32(total)


# --------------------------------------------------------------------------
# Row-wise path: do_root=True needs per-row means before the root.
# --------------------------------------------------------------------------
def _rooted_kernel(m_ref, t_ref, out_ref, row_acc, scal_acc, *,
                   p, n_rows, last, tile_rows, tile_last,
                   row_tiles_per_core, need_row_mask, need_col_mask):
    """Grid = (ncores, row_tiles_per_core, last_tiles)."""
    c = pl.program_id(0)
    i = pl.program_id(1)
    k = pl.program_id(2)
    nk = pl.num_programs(2)

    @pl.when(jnp.logical_and(i == 0, k == 0))
    def _():
        scal_acc[...] = jnp.zeros_like(scal_acc)

    @pl.when(k == 0)
    def _():
        row_acc[...] = jnp.zeros_like(row_acc)

    loss = _elem_loss(m_ref, t_ref, p)

    if need_row_mask or need_col_mask:   # static flags, no cost on aligned shapes
        ok = None
        if need_row_mask:
            ids_r = lax.broadcasted_iota(jnp.int32, (tile_rows, tile_last), 0)
            r0 = (c * row_tiles_per_core + i) * tile_rows
            ok = ids_r < (n_rows - r0)
        if need_col_mask:
            ids_c = lax.broadcasted_iota(jnp.int32, (tile_rows, tile_last), 1)
            okc = ids_c < (last - k * tile_last)
            ok = okc if ok is None else jnp.logical_and(ok, okc)
        loss = jnp.where(ok, loss, 0.0)   # masked rows -> sum 0 -> root 0

    row_acc[...] += jnp.sum(loss, axis=-1, keepdims=True)

    @pl.when(k == nk - 1)
    def _():
        mean = row_acc[...] * (1.0 / last)
        if p == 1:
            rooted = mean
        elif p == 2:
            rooted = jnp.sqrt(mean)
        else:
            rooted = mean ** (1.0 / p)
        scal_acc[...] += jnp.sum(rooted, keepdims=True)

    @pl.when(jnp.logical_and(i == pl.num_programs(1) - 1, k == nk - 1))
    def _():
        out_ref[0] = jnp.broadcast_to(scal_acc[...] * (1.0 / n_rows), (8, 128))


def _pnorm_loss_rowwise(mask, target, *, p, n_rows, last):
    ncores, block_bytes, vmem_limit = _tpu_config()
    m2d = mask.reshape(n_rows, last)
    t2d = target.reshape(n_rows, last)

    # Tile the last dim only when a single row-stripe would blow the block budget.
    if last * 8 * 4 <= block_bytes:
        tile_last = last
    else:
        tile_last = (block_bytes // (8 * 4)) // 128 * 128
    tile_rows = max(8, (block_bytes // (tile_last * 4)) // 8 * 8)
    tile_rows = min(tile_rows, (n_rows // 8) * 8)

    num_row_tiles = pl.cdiv(n_rows, tile_rows)
    row_tiles_per_core = pl.cdiv(num_row_tiles, ncores)
    nk = pl.cdiv(last, tile_last)
    need_row_mask = (ncores * row_tiles_per_core * tile_rows != n_rows)
    need_col_mask = (nk * tile_last != last)

    kernel = functools.partial(
        _rooted_kernel, p=p, n_rows=n_rows, last=last, tile_rows=tile_rows,
        tile_last=tile_last, row_tiles_per_core=row_tiles_per_core,
        need_row_mask=need_row_mask, need_col_mask=need_col_mask)

    last_row_tile = num_row_tiles - 1

    def in_map(c, i, k):
        return (jnp.minimum(c * row_tiles_per_core + i, last_row_tile), k)

    out = pl.pallas_call(
        kernel,
        out_shape=jax.ShapeDtypeStruct((ncores, 8, 128), jnp.float32),
        grid_spec=pltpu.PrefetchScalarGridSpec(
            num_scalar_prefetch=0,
            grid=(ncores, row_tiles_per_core, nk),
            in_specs=[pl.BlockSpec((tile_rows, tile_last), in_map),
                      pl.BlockSpec((tile_rows, tile_last), in_map)],
            out_specs=pl.BlockSpec((1, 8, 128), lambda c, i, k: (c, 0, 0)),
            scratch_shapes=[pltpu.VMEM((tile_rows, 1), jnp.float32),
                            pltpu.VMEM((1, 1), jnp.float32)],
        ),
        compiler_params=pltpu.CompilerParams(
            dimension_semantics=("parallel", "arbitrary", "arbitrary"),
            vmem_limit_bytes=vmem_limit,
        ),
    )(m2d, t2d)
    # Each core's partial already divided by global n_rows; sum per-core scalars.
    return jnp.sum(out[:, 0, 0])


# --------------------------------------------------------------------------
# Reference (pure JAX) — also used as small-input / incompatible-shape fallback.
# --------------------------------------------------------------------------
def pnorm_loss_ref(mask, target, *, p=2, do_root=False):
    diff = jnp.abs(mask.astype(jnp.float32) - target.astype(jnp.float32))
    loss = diff if p == 1 else diff ** p
    p_norm = jnp.mean(loss, axis=-1)
    if do_root:
        p_norm = p_norm ** (1.0 / p)
    return jnp.mean(p_norm)


# --------------------------------------------------------------------------
# Public wrapper
# --------------------------------------------------------------------------
def pnorm_loss(mask, target, *, p=2, do_root=False, weight=None, percentile=0.95,
               min_pallas_elems=_MIN_PALLAS_ELEMS):
    """Pallas implementation of PNormLoss.forward for weight=None."""
    # TODO(synk): weighted path (weight is not None) needs the global
    # min/max(target) pre-pass; not implemented since the module default is
    # weight=None.
    assert weight is None, "only the default weight=None path is implemented"
    assert mask.shape == target.shape

    shape = mask.shape
    last = shape[-1] if len(shape) >= 1 else 1
    n_rows = 1
    for d in shape[:-1]:
        n_rows *= d
    total = n_rows * last

    if total < min_pallas_elems:
        return pnorm_loss_ref(mask, target, p=p, do_root=do_root)

    if not do_root:
        # mean(mean(loss, -1)) == sum(loss)/total since every row has `last` elems.
        if _choose_lanes(total) is None:
            return pnorm_loss_ref(mask, target, p=p, do_root=do_root)
        return _pnorm_loss_separable(mask, target, p=p, total=total)

    # do_root=True: lane-sparse / tiny layouts go to plain XLA.
    if last < 128 or last % 128 != 0 or n_rows < 8:
        return pnorm_loss_ref(mask, target, p=p, do_root=do_root)
    return _pnorm_loss_rowwise(mask, target, p=p, n_rows=n_rows, last=last)


if __name__ == "__main__":
    key = jax.random.PRNGKey(0)
    k1, k2, k3, k4 = jax.random.split(key, 4)

    # NCHW-like small shape: batch=2, channels=4, spatial=16x16.
    x_shape = (2, 4, 16, 16)
    mask = jax.random.normal(k1, x_shape, dtype=jnp.float32)
    target = jax.random.normal(k2, x_shape, dtype=jnp.float32)

    # Default module config (p=2, do_root=False): small input -> XLA fast path.
    out_small = jax.block_until_ready(pnorm_loss(mask, target, p=2, do_root=False))
    ref_small = pnorm_loss_ref(mask, target, p=2, do_root=False)
    assert jnp.allclose(out_small, ref_small, rtol=1e-5, atol=1e-5), (out_small, ref_small)

    # Force the Pallas streaming kernel on the same small shape.
    out_pallas = jax.block_until_ready(
        pnorm_loss(mask, target, p=2, do_root=False, min_pallas_elems=0))
    assert jnp.allclose(out_pallas, ref_small, rtol=1e-5, atol=1e-5), (out_pallas, ref_small)

    # Non-default do_root=True path (row-wise Pallas kernel; last dim 256).
    r_shape = (2, 4, 8, 256)
    mask_r = jax.random.normal(k3, r_shape, dtype=jnp.float32)
    target_r = jax.random.normal(k4, r_shape, dtype=jnp.float32)
    out_root = jax.block_until_ready(
        pnorm_loss(mask_r, target_r, p=2, do_root=True, min_pallas_elems=0))
    ref_root = pnorm_loss_ref(mask_r, target_r, p=2, do_root=True)
    assert jnp.allclose(out_root, ref_root, rtol=1e-5, atol=1e-5), (out_root, ref_root)

    print("KERNEL_OK")
</pallas_src>

<mosaic_0001>
module attributes {stable_mosaic.version = 11 : i64} {
  func.func @_sum_pow_kernel(%arg0: i32, %arg1: i32, %arg2: memref<8x256xf32, #tpu.memory_space<vmem>>, %arg3: memref<8x256xf32, #tpu.memory_space<vmem>>, %arg4: memref<1x8x256xf32, #tpu.memory_space<vmem>>, %arg5: memref<8x256xf32, #tpu.memory_space<vmem>>) attributes {dimension_semantics = [#tpu.dimension_semantics<parallel>, #tpu.dimension_semantics<arbitrary>], iteration_bounds = array<i64: 2, 1>, scalar_prefetch = 0 : i64, scratch_operands = 1 : i64, tpu.core_type = #tpu.core_type<tc>, window_params = [{transform_indices = @transform_0, window_bounds = array<i64: 8, 256>}, {transform_indices = @transform_1, window_bounds = array<i64: 8, 256>}, {transform_indices = @transform_2, window_bounds = array<i64: 1, 8, 256>}]} {
    %c0_i32 = arith.constant 0 : i32
    %0 = arith.cmpi eq, %arg1, %c0_i32 : i32
    %1 = arith.extui %0 : i1 to i32
    %c0_i32_0 = arith.constant 0 : i32
    %2 = arith.cmpi ne, %1, %c0_i32_0 : i32
    scf.if %2 {
      %cst_12 = arith.constant 0.000000e+00 : f32
      %25 = vector.broadcast %cst_12 : f32 to vector<8x256xf32>
      %c0_13 = arith.constant 0 : index
      %c0_14 = arith.constant 0 : index
      %26 = vector.load %arg5[%c0_13, %c0_14] : memref<8x256xf32, #tpu.memory_space<vmem>>, vector<8x256xf32>
      tpu.vector_store %arg5[%c0_13, %c0_14], %25 {strides = array<i32>} : memref<8x256xf32, #tpu.memory_space<vmem>>, vector<8x256xf32>,
    } else {
    }
    %c0 = arith.constant 0 : index
    %c0_1 = arith.constant 0 : index
    %3 = vector.load %arg2[%c0, %c0_1] : memref<8x256xf32, #tpu.memory_space<vmem>>, vector<8x256xf32>
    %c0_2 = arith.constant 0 : index
    %c0_3 = arith.constant 0 : index
    %4 = vector.load %arg3[%c0_2, %c0_3] : memref<8x256xf32, #tpu.memory_space<vmem>>, vector<8x256xf32>
    %5 = arith.subf %3, %4 : vector<8x256xf32>
    %6 = math.absf %5 : vector<8x256xf32>
    %7 = arith.mulf %6, %6 : vector<8x256xf32>
    %c1_i32 = arith.constant 1 : i32
    %8 = arith.muli %arg0, %c1_i32 : i32
    %9 = arith.addi %8, %arg1 : i32
    %c8_i32 = arith.constant 8 : i32
    %10 = arith.muli %9, %c8_i32 : i32
    %c8_i32_4 = arith.constant 8 : i32
    %11 = arith.subi %c8_i32_4, %10 : i32
    %12 = tpu.iota {dimensions = array<i32: 0>} : vector<8x256xi32>
    %13 = vector.broadcast %11 : i32 to vector<8x256xi32>
    %14 = arith.cmpi slt, %12, %13 : vector<8x256xi32>
    %cst = arith.constant 0.000000e+00 : f32
    %15 = vector.broadcast %cst : f32 to vector<8x256xf32>
    %16 = arith.select %14, %7, %15 : vector<8x256xi1>, vector<8x256xf32>
    %c0_5 = arith.constant 0 : index
    %c0_6 = arith.constant 0 : index
    %17 = vector.load %arg5[%c0_5, %c0_6] : memref<8x256xf32, #tpu.memory_space<vmem>>, vector<8x256xf32>
    %18 = vector.shape_cast %16 : vector<8x256xf32> to vector<1x8x256xf32>
    %cst_7 = arith.constant dense<0.000000e+00> : vector<8x256xf32>
    %19 = vector.multi_reduction <add>, %18, %cst_7 [0] : vector<1x8x256xf32> to vector<8x256xf32>
    %20 = arith.addf %17, %19 : vector<8x256xf32>
    %c0_8 = arith.constant 0 : index
    %c0_9 = arith.constant 0 : index
    %21 = vector.load %arg5[%c0_8, %c0_9] : memref<8x256xf32, #tpu.memory_space<vmem>>, vector<8x256xf32>
    tpu.vector_store %arg5[%c0_8, %c0_9], %20 {strides = array<i32>} : memref<8x256xf32, #tpu.memory_space<vmem>>, vector<8x256xf32>,
    %c0_i32_10 = arith.constant 0 : i32
    %22 = arith.cmpi eq, %arg1, %c0_i32_10 : i32
    %23 = arith.extui %22 : i1 to i32
    %c0_i32_11 = arith.constant 0 : i32
    %24 = arith.cmpi ne, %23, %c0_i32_11 : i32
    scf.if %24 {
      %c0_12 = arith.constant 0 : index
      %c0_13 = arith.constant 0 : index
      %25 = vector.load %arg5[%c0_12, %c0_13] : memref<8x256xf32, #tpu.memory_space<vmem>>, vector<8x256xf32>
      %c0_14 = arith.constant 0 : index
      %c0_15 = arith.constant 0 : index
      %c0_16 = arith.constant 0 : index
      %26 = vector.load %arg4[%c0_14, %c0_15, %c0_16] : memref<1x8x256xf32, #tpu.memory_space<vmem>>, vector<1x8x256xf32>
      %27 = vector.shape_cast %26 : vector<1x8x256xf32> to vector<8x256xf32>
      %28 = vector.shape_cast %25 : vector<8x256xf32> to vector<1x8x256xf32>
      tpu.vector_store %arg4[%c0_14, %c0_15, %c0_16], %28 {strides = array<i32>} : memref<1x8x256xf32, #tpu.memory_space<vmem>>, vector<1x8x256xf32>,
    } else {
    }
    return
  }
  func.func @transform_0(%arg0: i32, %arg1: i32) -> (i32, i32) {
    %c1_i32 = arith.constant 1 : i32
    %0 = arith.muli %arg0, %c1_i32 : i32
    %1 = arith.addi %0, %arg1 : i32
    %c0_i32 = arith.constant 0 : i32
    %2 = arith.minsi %1, %c0_i32 : i32
    %c0_i32_0 = arith.constant 0 : i32
    %c0_i32_1 = arith.constant 0 : i32
    return %2, %c0_i32_0 : i32, i32
  }
  func.func @transform_1(%arg0: i32, %arg1: i32) -> (i32, i32) {
    %c1_i32 = arith.constant 1 : i32
    %0 = arith.muli %arg0, %c1_i32 : i32
    %1 = arith.addi %0, %arg1 : i32
    %c0_i32 = arith.constant 0 : i32
    %2 = arith.minsi %1, %c0_i32 : i32
    %c0_i32_0 = arith.constant 0 : i32
    %c0_i32_1 = arith.constant 0 : i32
    return %2, %c0_i32_0 : i32, i32
  }
  func.func @transform_2(%arg0: i32, %arg1: i32) -> (i32, i32, i32) {
    %c0_i32 = arith.constant 0 : i32
    %c0_i32_0 = arith.constant 0 : i32
    %c0_i32_1 = arith.constant 0 : i32
    return %arg0, %c0_i32, %c0_i32_0 : i32, i32, i32
  }
}

</mosaic_0001>

<bundles_post_ra>
// kernel: tpu_custom_call.1
= control target key start
LH: loop header
LB: loop body
LE: loop exit
PB: predicated region body
PF: predicated region fallthrough
CT: control target
= control target key end

     0   :  { %7 = vsyncpa [#allocation4], 0  ;;  %s865_s0 = inlined_call_operand.hbm [shape: f32[8,256], index: 0, kind: input, shape index: {}]   ;;  %s866_s1 = inlined_call_operand.hbm [shape: f32[8,256], index: 1, kind: input, shape index: {}]   ;;  %s867_s2 = inlined_call_operand.hbm [shape: f32[2,8,256], index: 2, kind: output, shape index: {}]  }
   0x1   :  { %9 = vsyncpa [#allocation4 + $0x1], 0 }
   0x2   :  { %10 = vsyncpa [#allocation7], 0 }
   0x3   :  { %12 = vsyncpa [#allocation7 + $0x1], 0 }
   0x4   :  { %13 = vsyncpa [#allocation5], 0 }
   0x5   :  { %15 = vsyncpa [#allocation5 + $0x1], 0  ;;  %s696_s9 = smov 0   ;;  %s698_s10 = smov 0  }
   0x6   :  { %s700_s11 = smov 0   ;;  %s702_s12 = smov 0  }
   0x7   :  { %s704_s13 = smov 0   ;;  %s706_s14 = smov 0  }
   0x8   :  { %s708_s15 = smov 0   ;;  %s710_s16 = smov 0  }
   0x9 LB: > { %s396_s17 = sadd.s32 4294967295, %s677_s16   ;;  %s397_s18 = sadd.s32 4294967294, %s677_s16   ;;  %s677_s16 = sphi %s710_s16, %s21_s16   ;;  %s673_s15 = sphi %s708_s15, %s879_s15   ;;  %s669_s14 = sphi %s706_s14, %s878_s14   ;;  %s665_s13 = sphi %s704_s13, %s855_s13   ;;  %s661_s12 = sphi %s702_s12, %s877_s12   ;;  %s657_s11 = sphi %s700_s11, %s876_s11   ;;  %s653_s10 = sphi %s698_s10, %s875_s10   ;;  %s649_s9 = sphi %s696_s9, %s874_s9  }
   0xa   : > { %s33_s19 = sadd.s32 1, %s673_s15  ;;  %p646_p1 = scmp.ne.s32.totalorder %s665_s13, 0 }
   0xb   : > { %p35_p0 = scmp.ge.s32.totalorder %s33_s19, 2  ;;  %p54_p2 = scmp.eq.s32.totalorder %s677_s16, 0 }
   0xc   : > { %p59_p3 = scmp.ne.s32.totalorder %s665_s13, %s661_s12  ;;  %p60_p5 = scmp.eq.s32.totalorder %s396_s17, 0 }
   0xd   : > { %s881_s19 = smov (%p35_p0, %s33_s19), 0  ;;  %p742_p4 = por %p646_p1, %p54_p2 }
   0xe   : > { %p746_p6 = por %p60_p5, %p59_p3  ;;  %s101_s22 = ssub.s32 %s673_s15, %s881_s19 }
   0xf   : > { %p102_p7 = scmp.eq.s32.totalorder %s101_s22, 0  ;;  %s104_s23 = sadd.s32 1, %s657_s11 }
  0x10   : > { %p114_p8 = scmp.ne.s32.totalorder %s657_s11, %s653_s10  ;;  %p115_p9 = scmp.eq.s32.totalorder %s396_s17, 1 }
  0x11   : > { %s754_s24 = scalar_select %p102_p7, %s657_s11, %s104_s23  }
  0x12   : > { %p120_p10 = scmp.ne.s32.totalorder %s653_s10, %s649_s9  ;;  %p121_p11 = scmp.eq.s32.totalorder %s397_s18, 1 }
  0x13   : > { %p760_p12 = por %p115_p9, %p114_p8  ;;  %p399_p13 = scmp.ge.s32.totalorder %s677_s16, 2 }
  0x14   : > { %p765_p0 = por %p121_p11, %p120_p10  ;;  %p436_p1 = scmp.lt.s32.totalorder %s677_s16, 2 }
  0x15   : > { %s155_s29 = sshll.u32 %s865_s0, 4  ;;  %s679_s30 = smov [#allocation3]   ;;  %s156_s29 = int_to_ptr.hbm [resolvable:$true] %s155_s29 }
  0x16   : > { %s157_s3 = sshll.u32 %s679_s30, 4  ;;  %p775_p2 = pnand %p436_p1, %p742_p4  ;;  %s158_s3 = int_to_ptr.vmem [resolvable:$true] %s157_s3 }
  0x17   : > { %p406_p3 = scmp.ge.s32.totalorder %s677_s16, 1  ;;  %p185_p5 = scmp.lt.s32.totalorder %s677_s16, 3 }
  0x18   : > { %s510_s5 = sshra.s32 %s156_s29, 4  ;;  %p514_p8 = pneg %p775_p2  ;;  %s511_s5 = int_to_ptr.hbm [resolvable:$true] %s510_s5 }
  0x19   : > { %s512_s6 = scalar_lea.hbm %s511_s5, 16  ;;  %s517_s12 = scalar_lea.hbm %s865_s0, 16 }
  0x1a   : > { %p513_p7 = scmp.ne.s32.totalorder %s511_s5, %s512_s6  ;;  %p519_p4 = scmp.lt.s32.totalorder %s517_s12, %s512_s6 }
  0x1c   : > { %p515_p9 = pnand %p514_p8, %p513_p7 }
  0x1e   : > { %p516_p10 = pneg %p515_p9 }
  0x20   : > { %p521_p11 = pnand %p519_p4, %p516_p10 }
  0x22   : > { %524 = shalt.err (!%p521_p11)
}
  0x23   : > { %428 = dma.hbm_to_vmem [thread:$0]  (!%p775_p2), %s156_s29, 256, %s158_s3, [#allocation4]  }
  0x24   : > { %p795_p1 = pnand %p406_p3, %p185_p5  ;;  %s178_s22 = sshll.u32 %s866_s1, 4  ;;  %s179_s22 = int_to_ptr.hbm [resolvable:$true] %s178_s22 }
  0x25   : > { %s680_s23 = smov [#allocation6]   ;;  %s540_s28 = sshra.s32 %s179_s22, 4  ;;  %s541_s28 = int_to_ptr.hbm [resolvable:$true] %s540_s28 }
  0x26   : > { %s180_s27 = sshll.u32 %s680_s23, 4  ;;  %s542_s30 = scalar_lea.hbm %s541_s28, 16  ;;  %s181_s27 = int_to_ptr.vmem [resolvable:$true] %s180_s27 }
  0x27   : > { %p543_p7 = scmp.ne.s32.totalorder %s541_s28, %s542_s30  ;;  %s547_s5 = scalar_lea.hbm %s866_s1, 16 }
  0x28   : > { %p549_p3 = scmp.lt.s32.totalorder %s547_s5, %s542_s30 }
  0x29   : > { %p545_p9 = pnand %p543_p7, %p514_p8 }
  0x2b   : > { %p546_p10 = pneg %p545_p9 }
  0x2d   : > { %p551_p5 = pnand %p549_p3, %p546_p10 }
  0x2f   : > { %554 = shalt.err (!%p551_p5)
}
  0x30   : > { %431 = dma.hbm_to_vmem [thread:$0]  (!%p775_p2), %s179_s22, 256, %s181_s27, [#allocation7]  }
  0x31   : > { %189 = sbr.rel (%p795_p1) target bundleno = 74 (0x4a), region = 28  ;;  %s191_s6 = sand.u32 (!%p795_p1), 1, %s665_s13  }
  0x32   : > { %s407_s7 = sshll.u32 (!%p795_p1), %s191_s6, 4  ;;  %s192_s8 = scalar_lea.sflag (!%p795_p1), [#allocation4], %s191_s6 }
  0x33   : > { %s195_s12 = scalar_lea.vmem (!%p795_p1), [#allocation3], %s407_s7 }
  0x36   : > { %635 = dma.done.wait (%p746_p6), %s192_s8, 256  }
  0x37   : > { %637 = vsyncadd (%p746_p6), %s192_s8, 4294967040  ;;  %s202_s18 = scalar_lea.sflag [#allocation7], %s191_s6  ;;  %s205_s20 = scalar_lea.vmem [#allocation6], %s407_s7 }
  0x38   : > { %639 = dma.done.wait (%p746_p6), %s202_s18, 256  }
  0x39   : > { %641 = vsyncadd (%p746_p6), %s202_s18, 4294967040  ;;  %s229_s4 = sand.u32 1, %s653_s10   ;;  %s410_s17 = sshll.u32 %s669_s14, 3  ;;  %v257_v0 = vlaneseq  ;;  %v244_v1 = vld [vmem:[%s195_s12] sm:$0xff]  ;;  %v245_v4 = vld [vmem:[%s195_s12 + $0x8] sm:$0xff] }
  0x3a   : > { %s409_s22 = sshll.u32 %s229_s4, 4  ;;  %s256_s23 = ssub.s32 8, %s410_s17  ;;  %v246_v2 = vld [vmem:[%s205_s20] sm:$0xff]  ;;  %v247_v7 = vld [vmem:[%s205_s20 + $0x8] sm:$0xff] }
  0x3b   : > { %s418_s27 = sshll.u32 %s669_s14, 4  ;;  %v258_v3 = vshrl.u32 %v257_v0, 7  ;;  %v248_v5 = vsub.f32 %v244_v1, %v246_v2  ;;  %v259_v6 = vstv %s256_s23  ;;  %v249_v8 = vsub.f32 %v245_v4, %v247_v7  ;;  %s231_s29 = scalar_lea.vmem [#allocation8], %s409_s22 }
  0x3c   : > { %s290_s21 = scalar_lea.hbm %s867_s2, %s418_s27  ;;  %s292_s3 = sshll.u32 %s231_s29, 4  ;;  %s293_s3 = int_to_ptr.vmem [resolvable:$true] %s292_s3 }
  0x3d   : > { %v250_v9 = vand.u32 2147483647, %v248_v5  ;;  %vm260_vm0 = vcmp.lt.s32.totalorder %v258_v3, %v259_v6  ;;  %v251_v10 = vand.u32 2147483647, %v249_v8  ;;  %s294_s5 = sshll.u32 %s290_s21, 4  ;;  %s279_s14 = scalar_lea.sflag [#allocation5], %s229_s4  ;;  %s295_s5 = int_to_ptr.hbm [resolvable:$true] %s294_s5 }
  0x3e   : > { %s584_s6 = sshra.s32 %s295_s5, 4  ;;  %s590_s18 = scalar_lea.hbm %s867_s2, 32  ;;  %s585_s6 = int_to_ptr.hbm [resolvable:$true] %s584_s6 }
  0x3f   : > { %v252_v11 = vmul.f32 %v250_v9, %v250_v9  ;;  %v253_v12 = vmul.f32 %v251_v10, %v251_v10  ;;  %s586_s7 = scalar_lea.hbm %s585_s6, 16  ;;  %p591_p4 = scmp.lt.s32.totalorder %s585_s6, %s867_s2 }
  0x40   : > { %p587_p6 = scmp.ne.s32.totalorder %s585_s6, %s586_s7  ;;  %p592_p11 = scmp.lt.s32.totalorder %s590_s18, %s586_s7 }
  0x41   : > { %v261_v13 = vsel %vm260_vm0, %v252_v11, 0.0  ;;  %v262_v14 = vsel %vm260_vm0, %v253_v12, 0.0 }
  0x42   : > { %276 = vst [vmem:[%s231_s29] sm:$0xff] %v261_v13  ;;  %p588_p2 = pnand %p587_p6, %p760_p12  ;;  %p593_p1 = por %p592_p11, %p591_p4 }
  0x43   : > { %277 = vst [vmem:[%s231_s29 + $0x8] sm:$0xff] %v262_v14 }
  0x44   : > { %p589_p8 = pneg %p588_p2 }
  0x46   : > { %p594_p7 = pnand %p593_p1, %p589_p8 }
  0x48   : > { %597 = shalt.err (!%p594_p7)
}
  0x49   : > { %423 = dma.vmem_to_hbm [thread:$0]  (%p760_p12), %s293_s3, 256, %s295_s5, %s279_s14  }
  0x4a PF: > { %s306_s4 = sand.u32 1, %s649_s9   ;;  %p433_p9 = pnand %p399_p13, %p765_p0 }
  0x4b   : > { %s307_s22 = scalar_lea.sflag [#allocation5], %s306_s4 }
  0x4c   : > { %p434_p10 = pneg %p433_p9 }
  0x4e   : > { %643 = dma.done.wait (%p434_p10), %s307_s22, 256  }
  0x4f   : > { %645 = vsyncadd (%p434_p10), %s307_s22, 4294967040  ;;  %s21_s16 = sadd.s32 1, %s677_s16   ;;  %s874_s9 = smov %s653_s10 }
  0x50   : > { %p18_p3 = scmp.ge.s32.totalorder %s21_s16, 4   ;;  %s875_s10 = smov %s657_s11 }
  0x51   : > { %s876_s11 = smov %s754_s24  ;;  %s877_s12 = smov %s665_s13 }
  0x52   : > { %s855_s13 = smov 0   ;;  %s878_s14 = smov %s673_s15 }
  0x53   : > { %s879_s15 = smov %s881_s19  ;;  %20 = sbr.rel (!%p18_p3) target bundleno = 9 (0x9), region = 94 }
  0x58   :  { %313 = vsyncpa [#allocation4], 1 }
  0x59   :  { %315 = vsyncpa [#allocation4 + $0x1], 1 }
  0x5a   :  { %316 = vsyncpa [#allocation7], 1 }
  0x5b   :  { %318 = vsyncpa [#allocation7 + $0x1], 1 }
  0x5c   :  { %319 = vsyncpa [#allocation5], 1 }
  0x5d   :  { %321 = vsyncpa [#allocation5 + $0x1], 1 }

</bundles_post_ra>
